<compile_context>
chip_gen: v7x
topology: tpu7x:2x2x1
jax: 0.10.0
libtpu: 0.0.40
codegen_flags: <defaults>
</compile_context>

<pallas_src>
import math
from functools import partial

import jax
import jax.numpy as jnp
from jax import lax
from jax.experimental import pallas as pl
from jax.experimental.pallas import tpu as pltpu


def _cdiv(a: int, b: int) -> int:
    return -(-a // b)


# ----------------------------------------------------------------------------
# Padding helpers (exact re-implementation of the PyTorch reference semantics)
# ----------------------------------------------------------------------------
def get_extra_padding_for_conv1d(length: int, kernel_size: int, stride: int,
                                 padding_total: int = 0) -> int:
    n_frames = (length - kernel_size + padding_total) / stride + 1
    ideal_length = (math.ceil(n_frames) - 1) * stride + (kernel_size - padding_total)
    return ideal_length - length


def pad1d(x, paddings, mode: str = "constant", value: float = 0.0):
    """jnp re-implementation of pad1d from streamable.py (x is [B, C, L])."""
    padding_left, padding_right = paddings
    assert padding_left >= 0 and padding_right >= 0
    length = x.shape[-1]
    if mode == "reflect":
        max_pad = max(padding_left, padding_right)
        extra_pad = 0
        if length <= max_pad:
            extra_pad = max_pad - length + 1
            x = jnp.pad(x, ((0, 0), (0, 0), (0, extra_pad)))
        padded = jnp.pad(x, ((0, 0), (0, 0), (padding_left, padding_right)),
                         mode="reflect")
        end = padded.shape[-1] - extra_pad
        return padded[..., :end]
    return jnp.pad(x, ((0, 0), (0, 0), (padding_left, padding_right)),
                   mode="constant", constant_values=value)


def _pad_and_align(x, pad_left, pad_right, extra_zeros, mode, value=0.0):
    """Semantic pad1d(x, (pad_left, pad_right), mode) followed by `extra_zeros`
    alignment zeros on the right.  For constant mode everything is folded into
    a SINGLE jnp.pad (one HBM copy instead of two)."""
    if mode == "reflect":
        x = pad1d(x, (pad_left, pad_right), mode="reflect")
        if extra_zeros:
            x = jnp.pad(x, ((0, 0), (0, 0), (0, extra_zeros)))
        return x
    # TODO(synk): 'replicate'/'circular' pad modes fall back to constant padding.
    return jnp.pad(x, ((0, 0), (0, 0), (pad_left, pad_right + extra_zeros)),
                   mode="constant", constant_values=value)


# ----------------------------------------------------------------------------
# Pallas kernels: one fused (C_out, K*C_in) x (K*C_in, TILE_L) matmul per tile
# ----------------------------------------------------------------------------
def _conv_kernel_halo(xm_ref, xh_ref, w_ref, b_ref, o_ref, slab_ref, *,
                      n_taps, c_in, stride, dilation, tile_l):
    # xm_ref : (S, C_in, TILE_L)  main polyphase tile (time on lanes)
    # xh_ref : (S, C_in, HALO)    right halo (next >=128 columns)
    # w_ref  : (C_out, K*C_in)    packed weight (resident across grid)
    # b_ref  : (C_out, 1)         f32 bias (resident)
    # o_ref  : (C_out, TILE_L)    lane-dense output tile
    # slab   : (K*C_in, TILE_L)   VMEM scratch, fused-matmul RHS
    for k in range(n_taps):                      # small static unroll
        off = k * dilation
        q, r = off // stride, off % stride       # static ints
        rows = slice(k * c_in, (k + 1) * c_in)
        if q == 0:
            slab_ref[rows, :] = xm_ref[r]
        elif q == tile_l:                        # whole row comes from the halo
            slab_ref[rows, :] = xh_ref[r][:, :tile_l]
        else:
            slab_ref[rows, :tile_l - q] = xm_ref[r][:, q:]
            slab_ref[rows, tile_l - q:] = xh_ref[r][:, :q]
    acc = jnp.dot(w_ref[...], slab_ref[...], preferred_element_type=jnp.float32)
    o_ref[...] = (acc + b_ref[...]).astype(o_ref.dtype)


def _conv_kernel_nohalo(xm_ref, w_ref, b_ref, o_ref, slab_ref, *,
                        n_taps, c_in, stride, dilation):
    # q_max == 0: every tap stays inside the main tile (no halo DMA at all).
    for k in range(n_taps):
        r = (k * dilation) % stride
        slab_ref[k * c_in:(k + 1) * c_in, :] = xm_ref[r]
    acc = jnp.dot(w_ref[...], slab_ref[...], preferred_element_type=jnp.float32)
    o_ref[...] = (acc + b_ref[...]).astype(o_ref.dtype)


def _conv_kernel_direct(x_ref, w_ref, b_ref, o_ref):
    # Non-overlapping frames: the input block IS the matmul RHS. One DMA + one dot.
    acc = jnp.dot(w_ref[...], x_ref[...], preferred_element_type=jnp.float32)
    o_ref[...] = (acc + b_ref[...]).astype(o_ref.dtype)


# ----------------------------------------------------------------------------
# Tiling / VMEM budgeting
# ----------------------------------------------------------------------------
_VMEM_BUDGET = 40 * 1024 * 1024      # leaves headroom under v7x's 64 MiB


def _pick_tile_l(l_out, halo, itemsize, stride, c_in, c_out, n_taps,
                 out_itemsize, mode, override=None):
    if override is not None:
        t = max(halo, _cdiv(_cdiv(int(override), 128) * 128, halo) * halo)
    else:
        target = 1024 if itemsize <= 2 else 512     # bf16 tiles can be bigger
        t = min(target, _cdiv(max(l_out, 1), 128) * 128)
        t = _cdiv(t, halo) * halo

    def est(tl):
        phases = n_taps * c_in if mode == "direct" else stride * c_in
        v = 2 * phases * tl * itemsize                    # main tile (double-buffered)
        if mode == "halo":
            v += 2 * phases * halo * itemsize             # halo tile
        v += 2 * c_out * n_taps * c_in * itemsize         # resident packed weight
        v += 2 * c_out * 4                                # resident f32 bias
        v += 2 * c_out * tl * out_itemsize                # output tile
        if mode != "direct":
            v += n_taps * c_in * tl * itemsize            # slab scratch
        return v

    if override is None:
        while t > halo and est(t) > _VMEM_BUDGET:
            t -= halo
    return t, est(t)


# ----------------------------------------------------------------------------
# pallas_call builder
# ----------------------------------------------------------------------------
def _conv1d_pallas(mode, x_in, w2d, bias2d, *, n_taps, c_in, c_out, stride,
                   dilation, tile_l, halo, num_tiles, l_out, out_dtype,
                   vmem_limit, cost):
    b_sz = x_in.shape[0]
    cdt = x_in.dtype

    # Constant index_map -> the weight/bias blocks stay resident across the
    # grid (the pipeliner does not re-fetch blocks whose index doesn't change).
    w_spec = pl.BlockSpec((c_out, n_taps * c_in), lambda b, j: (0, 0))
    b_spec = pl.BlockSpec((c_out, 1), lambda b, j: (0, 0))
    out_spec = pl.BlockSpec((pl.Squeezed(), c_out, tile_l), lambda b, j: (b, 0, j))

    if mode == "direct":
        kernel = _conv_kernel_direct
        in_specs = [
            pl.BlockSpec((pl.Squeezed(), n_taps * c_in, tile_l),
                         lambda b, j: (b, 0, j)),
            w_spec, b_spec]
        scratch = []
        operands = (x_in, w2d, bias2d)
    elif mode == "nohalo":
        kernel = partial(_conv_kernel_nohalo, n_taps=n_taps, c_in=c_in,
                         stride=stride, dilation=dilation)
        in_specs = [
            pl.BlockSpec((pl.Squeezed(), stride, c_in, tile_l),
                         lambda b, j: (b, 0, 0, j)),
            w_spec, b_spec]
        scratch = [pltpu.VMEM((n_taps * c_in, tile_l), cdt)]
        operands = (x_in, w2d, bias2d)
    else:  # "halo" (general case)
        hbpt = tile_l // halo
        kernel = partial(_conv_kernel_halo, n_taps=n_taps, c_in=c_in,
                         stride=stride, dilation=dilation, tile_l=tile_l)
        in_specs = [
            pl.BlockSpec((pl.Squeezed(), stride, c_in, tile_l),
                         lambda b, j: (b, 0, 0, j)),
            pl.BlockSpec((pl.Squeezed(), stride, c_in, halo),
                         lambda b, j: (b, 0, 0, (j + 1) * hbpt)),
            w_spec, b_spec]
        scratch = [pltpu.VMEM((n_taps * c_in, tile_l), cdt)]
        operands = (x_in, x_in, w2d, bias2d)

    return pl.pallas_call(
        kernel,
        # Exact output shape: Pallas masks the ragged final-tile store, the
        # wrapper-side slice (and its extra HBM round trip) is gone.
        out_shape=jax.ShapeDtypeStruct((b_sz, c_out, l_out), out_dtype),
        grid=(b_sz, num_tiles),
        in_specs=in_specs,
        out_specs=out_spec,
        scratch_shapes=scratch,
        compiler_params=pltpu.CompilerParams(
            dimension_semantics=("parallel", "parallel"),
            vmem_limit_bytes=vmem_limit),
        cost_estimate=cost,
    )(*operands)


# ----------------------------------------------------------------------------
# StreamableConv1d forward (padding glue + fused Pallas conv)
# ----------------------------------------------------------------------------
def streamable_conv1d_forward(x, weight, bias, *, stride=1, dilation=1,
                              groups=1, causal=False, pad_mode="reflect",
                              activation=None, norm="none",
                              compute_dtype=jnp.bfloat16, tile_l=None):
    """x: [B, C_in, L]; weight: [C_out, C_in, K]; bias: [C_out] or None.

    norm='none'/'weight_norm'/'spectral_norm' are identities at forward time
    given the fused weight tensor.
    """
    # TODO(synk): groups != 1 (grouped conv) not implemented.
    # TODO(synk): norm='time_group_norm' (GroupNorm after conv) not implemented.
    assert groups == 1, "grouped conv not supported"
    assert norm != "time_group_norm", "time_group_norm not supported"
    if activation is not None:
        x = activation(x)

    out_dtype = x.dtype
    b_sz, c_in, length = x.shape
    c_out, c_in_w, n_taps = weight.shape
    assert c_in_w == c_in
    if bias is None:
        bias = jnp.zeros((c_out,), dtype=jnp.float32)

    kernel_eff = (n_taps - 1) * dilation + 1
    padding_total = kernel_eff - stride
    extra_padding = get_extra_padding_for_conv1d(length, kernel_eff, stride,
                                                 padding_total)
    if causal:
        pad_left, pad_right = padding_total, extra_padding
    else:
        pr = padding_total // 2
        pad_left, pad_right = padding_total - pr, pr + extra_padding

    l_pad = length + pad_left + pad_right
    l_out = (l_pad - kernel_eff) // stride + 1
    assert l_out > 0

    # bf16 operands for the MXU (single-pass path, half the DMA/VMEM bytes).
    cdt = jnp.dtype(compute_dtype)
    if x.dtype != cdt:
        x = x.astype(cdt)

    # ---- kernel path selection & tiling -------------------------------------
    q_max = ((n_taps - 1) * dilation) // stride
    if dilation == 1 and kernel_eff == stride:
        mode = "direct"           # non-overlapping frames (incl. K=1, stride=1)
    elif q_max == 0:
        mode = "nohalo"
    else:
        mode = "halo"
    halo = _cdiv(max(q_max, 1), 128) * 128 if mode == "halo" else 128

    tile, vmem_est = _pick_tile_l(l_out, halo, cdt.itemsize, stride, c_in,
                                  c_out, n_taps, jnp.dtype(out_dtype).itemsize,
                                  mode, override=tile_l)
    num_tiles = _cdiv(l_out, tile)
    vmem_limit = int(min(64 * 1024 * 1024,
                         max(32 * 1024 * 1024, vmem_est * 5 // 4)))

    # ---- build the kernel input (minimal wrapper copies) --------------------
    if mode == "direct":
        # Padded length is exactly l_out*stride; no alignment pad needed — the
        # ragged last input/output tile is masked by Pallas.
        x_p = _pad_and_align(x, pad_left, pad_right, 0, pad_mode)
        t_len = l_pad // stride
        if stride == 1:           # n_taps == 1 here: free reshape, no transpose
            x_in = x_p.reshape(b_sz, n_taps * c_in, t_len)
        else:
            x_in = (x_p.reshape(b_sz, c_in, t_len, stride)
                        .transpose(0, 3, 1, 2)
                        .reshape(b_sz, stride * c_in, t_len))
    else:
        l_ph = num_tiles * tile + (halo if mode == "halo" else 0)
        need = l_ph * stride
        x_p = _pad_and_align(x, pad_left, pad_right, need - l_pad, pad_mode)
        if stride == 1:           # skip the polyphase transpose (free reshape)
            x_in = x_p.reshape(b_sz, 1, c_in, l_ph)
        else:
            # x_in[b, r, c, m] = x_padded[b, c, m*stride + r]
            x_in = x_p.reshape(b_sz, c_in, l_ph, stride).transpose(0, 3, 1, 2)

    # ---- pack weight/bias to match the in-kernel slab layout ----------------
    # slab row k*C_in + c  <->  w2d column k*C_in + c = weight[o, c, k]
    w2d = jnp.transpose(weight, (0, 2, 1)).reshape(c_out, n_taps * c_in).astype(cdt)
    bias2d = bias.reshape(c_out, 1).astype(jnp.float32)

    cost = pl.CostEstimate(
        flops=int(2 * b_sz * c_out * n_taps * c_in * l_out),
        transcendentals=0,
        bytes_accessed=int(x_in.size * cdt.itemsize
                           + w2d.size * cdt.itemsize + bias2d.size * 4
                           + b_sz * c_out * l_out * jnp.dtype(out_dtype).itemsize))

    return _conv1d_pallas(mode, x_in, w2d, bias2d, n_taps=n_taps, c_in=c_in,
                          c_out=c_out, stride=stride, dilation=dilation,
                          tile_l=tile, halo=halo, num_tiles=num_tiles,
                          l_out=l_out, out_dtype=out_dtype,
                          vmem_limit=vmem_limit, cost=cost)


# ----------------------------------------------------------------------------
# Reference (pure JAX) for validation
# ----------------------------------------------------------------------------
def _reference_conv(x_padded, weight, bias, stride, dilation):
    out = lax.conv_general_dilated(
        x_padded, weight,
        window_strides=(stride,), padding="VALID",
        rhs_dilation=(dilation,),
        dimension_numbers=("NCH", "OIH", "NCH"),
        precision=lax.Precision.HIGHEST)
    return out + bias[None, :, None]


if __name__ == "__main__":
    # Configs covering: halo path (causal stride>1; non-causal dilation>1),
    # direct fast path (K=1/stride=1 and K==stride frames), the no-halo path
    # (q_max==0 with dilation>1), and a multi-tile case with stride>1 AND
    # dilation>1 plus a ragged final tile (halo wrap across >=3 tiles).
    configs = [
        dict(B=2, C_IN=4, C_OUT=8, L=16,  K=4, STRIDE=2, DILATION=1, CAUSAL=True,  TILE=None),
        dict(B=2, C_IN=4, C_OUT=8, L=16,  K=3, STRIDE=1, DILATION=3, CAUSAL=False, TILE=None),
        dict(B=2, C_IN=4, C_OUT=8, L=16,  K=1, STRIDE=1, DILATION=1, CAUSAL=True,  TILE=None),
        dict(B=2, C_IN=4, C_OUT=8, L=16,  K=2, STRIDE=2, DILATION=1, CAUSAL=False, TILE=None),
        dict(B=2, C_IN=4, C_OUT=8, L=32,  K=2, STRIDE=4, DILATION=3, CAUSAL=True,  TILE=None),
        dict(B=2, C_IN=4, C_OUT=8, L=800, K=5, STRIDE=2, DILATION=2, CAUSAL=True,  TILE=128),
    ]
    PAD_MODE = "reflect"
    key = jax.random.PRNGKey(0)
    for idx, cfg in enumerate(configs):
        B, C_IN, C_OUT, L = cfg["B"], cfg["C_IN"], cfg["C_OUT"], cfg["L"]
        K, STRIDE, DILATION = cfg["K"], cfg["STRIDE"], cfg["DILATION"]
        CAUSAL, TILE = cfg["CAUSAL"], cfg["TILE"]

        key, kx, kw, kb = jax.random.split(key, 4)
        x = jax.random.normal(kx, (B, C_IN, L), dtype=jnp.float32)
        bound = 1.0 / math.sqrt(C_IN * K)
        weight = jax.random.uniform(kw, (C_OUT, C_IN, K), dtype=jnp.float32,
                                    minval=-bound, maxval=bound)
        bias = jax.random.uniform(kb, (C_OUT,), dtype=jnp.float32,
                                  minval=-bound, maxval=bound)

        # Pure-JAX reference with identical padding.
        kernel_eff = (K - 1) * DILATION + 1
        padding_total = kernel_eff - STRIDE
        extra = get_extra_padding_for_conv1d(L, kernel_eff, STRIDE, padding_total)
        if CAUSAL:
            x_pad_ref = pad1d(x, (padding_total, extra), mode=PAD_MODE)
        else:
            pr = padding_total // 2
            x_pad_ref = pad1d(x, (padding_total - pr, pr + extra), mode=PAD_MODE)
        ref = _reference_conv(x_pad_ref, weight, bias, STRIDE, DILATION)

        # Exact path (f32 operands) for every config: tight tolerance.
        dtypes = [(jnp.float32, 1e-5, 1e-5)]
        # Default perf path (bf16 operands, f32 accumulation): loose tolerance.
        if idx in (0, 3, 5):
            dtypes.append((jnp.bfloat16, 5e-2, 5e-2))

        for cdt, atol, rtol in dtypes:
            out = streamable_conv1d_forward(
                x, weight, bias, stride=STRIDE, dilation=DILATION,
                causal=CAUSAL, pad_mode=PAD_MODE, activation=None,
                compute_dtype=cdt, tile_l=TILE)
            out = jax.block_until_ready(out)
            assert out.shape == ref.shape, (cfg, out.shape, ref.shape)
            assert jnp.allclose(out, ref, atol=atol, rtol=rtol), \
                (cfg, str(cdt), float(jnp.max(jnp.abs(out - ref))))

    print("KERNEL_OK")
</pallas_src>

<mosaic_0001>
module attributes {stable_mosaic.version = 11 : i64} {
  func.func @_conv_kernel_halo(%arg0: i32, %arg1: i32, %arg2: memref<1x2x4x128xf32, #tpu.memory_space<vmem>>, %arg3: memref<1x2x4x128xf32, #tpu.memory_space<vmem>>, %arg4: memref<8x16xf32, #tpu.memory_space<vmem>>, %arg5: memref<8x1xf32, #tpu.memory_space<vmem>>, %arg6: memref<1x8x128xf32, #tpu.memory_space<vmem>>, %arg7: memref<16x128xf32, #tpu.memory_space<vmem>>) attributes {dimension_semantics = [#tpu.dimension_semantics<parallel>, #tpu.dimension_semantics<parallel>], iteration_bounds = array<i64: 2, 1>, scalar_prefetch = 0 : i64, scratch_operands = 1 : i64, tpu.core_type = #tpu.core_type<tc>, window_params = [{transform_indices = @transform_0, window_bounds = array<i64: 1, 2, 4, 128>}, {transform_indices = @transform_1, window_bounds = array<i64: 1, 2, 4, 128>}, {pipeline_mode = #tpu.pipeline_mode<synchronous>, transform_indices = @transform_2, window_bounds = array<i64: 8, 16>}, {pipeline_mode = #tpu.pipeline_mode<synchronous>, transform_indices = @transform_3, window_bounds = array<i64: 8, 1>}, {transform_indices = @transform_4, window_bounds = array<i64: 1, 8, 128>}]} {
    %c0 = arith.constant 0 : index
    %c0_0 = arith.constant 0 : index
    %c0_1 = arith.constant 0 : index
    %c0_2 = arith.constant 0 : index
    %0 = vector.load %arg2[%c0, %c0_0, %c0_1, %c0_2] : memref<1x2x4x128xf32, #tpu.memory_space<vmem>>, vector<1x1x4x128xf32>
    %1 = vector.shape_cast %0 : vector<1x1x4x128xf32> to vector<4x128xf32>
    %c0_3 = arith.constant 0 : index
    %c0_4 = arith.constant 0 : index
    %2 = vector.load %arg7[%c0_3, %c0_4] : memref<16x128xf32, #tpu.memory_space<vmem>>, vector<4x128xf32>
    tpu.vector_store %arg7[%c0_3, %c0_4], %1 {strides = array<i32>} : memref<16x128xf32, #tpu.memory_space<vmem>>, vector<4x128xf32>,
    %c0_5 = arith.constant 0 : index
    %c1 = arith.constant 1 : index
    %c0_6 = arith.constant 0 : index
    %c0_7 = arith.constant 0 : index
    %3 = vector.load %arg2[%c0_5, %c1, %c0_6, %c0_7] : memref<1x2x4x128xf32, #tpu.memory_space<vmem>>, vector<1x1x4x128xf32>
    %4 = vector.shape_cast %3 : vector<1x1x4x128xf32> to vector<4x128xf32>
    %c4 = arith.constant 4 : index
    %c0_8 = arith.constant 0 : index
    %5 = vector.load %arg7[%c4, %c0_8] : memref<16x128xf32, #tpu.memory_space<vmem>>, vector<4x128xf32>
    tpu.vector_store %arg7[%c4, %c0_8], %4 {strides = array<i32>} : memref<16x128xf32, #tpu.memory_space<vmem>>, vector<4x128xf32>,
    %c0_9 = arith.constant 0 : index
    %c0_10 = arith.constant 0 : index
    %c0_11 = arith.constant 0 : index
    %c0_12 = arith.constant 0 : index
    %6 = vector.load %arg2[%c0_9, %c0_10, %c0_11, %c0_12] : memref<1x2x4x128xf32, #tpu.memory_space<vmem>>, vector<1x1x4x128xf32>
    %7 = vector.shape_cast %6 : vector<1x1x4x128xf32> to vector<4x128xf32>
    %8 = vector.extract_strided_slice %7 {offsets = [0, 1], sizes = [4, 127], strides = [1, 1]} : vector<4x128xf32> to vector<4x127xf32>
    %c8 = arith.constant 8 : index
    %c0_13 = arith.constant 0 : index
    %9 = vector.load %arg7[%c8, %c0_13] : memref<16x128xf32, #tpu.memory_space<vmem>>, vector<4x127xf32>
    tpu.vector_store %arg7[%c8, %c0_13], %8 {strides = array<i32>} : memref<16x128xf32, #tpu.memory_space<vmem>>, vector<4x127xf32>,
    %c0_14 = arith.constant 0 : index
    %c0_15 = arith.constant 0 : index
    %c0_16 = arith.constant 0 : index
    %c0_17 = arith.constant 0 : index
    %10 = vector.load %arg3[%c0_14, %c0_15, %c0_16, %c0_17] : memref<1x2x4x128xf32, #tpu.memory_space<vmem>>, vector<1x1x4x128xf32>
    %11 = vector.shape_cast %10 : vector<1x1x4x128xf32> to vector<4x128xf32>
    %12 = vector.extract_strided_slice %11 {offsets = [0, 0], sizes = [4, 1], strides = [1, 1]} : vector<4x128xf32> to vector<4x1xf32>
    %c8_18 = arith.constant 8 : index
    %c127 = arith.constant 127 : index
    %13 = vector.load %arg7[%c8_18, %c127] : memref<16x128xf32, #tpu.memory_space<vmem>>, vector<4x1xf32>
    tpu.vector_store %arg7[%c8_18, %c127], %12 {strides = array<i32>} : memref<16x128xf32, #tpu.memory_space<vmem>>, vector<4x1xf32>,
    %c0_19 = arith.constant 0 : index
    %c1_20 = arith.constant 1 : index
    %c0_21 = arith.constant 0 : index
    %c0_22 = arith.constant 0 : index
    %14 = vector.load %arg2[%c0_19, %c1_20, %c0_21, %c0_22] : memref<1x2x4x128xf32, #tpu.memory_space<vmem>>, vector<1x1x4x128xf32>
    %15 = vector.shape_cast %14 : vector<1x1x4x128xf32> to vector<4x128xf32>
    %16 = vector.extract_strided_slice %15 {offsets = [0, 1], sizes = [4, 127], strides = [1, 1]} : vector<4x128xf32> to vector<4x127xf32>
    %c12 = arith.constant 12 : index
    %c0_23 = arith.constant 0 : index
    %17 = vector.load %arg7[%c12, %c0_23] : memref<16x128xf32, #tpu.memory_space<vmem>>, vector<4x127xf32>
    tpu.vector_store %arg7[%c12, %c0_23], %16 {strides = array<i32>} : memref<16x128xf32, #tpu.memory_space<vmem>>, vector<4x127xf32>,
    %c0_24 = arith.constant 0 : index
    %c1_25 = arith.constant 1 : index
    %c0_26 = arith.constant 0 : index
    %c0_27 = arith.constant 0 : index
    %18 = vector.load %arg3[%c0_24, %c1_25, %c0_26, %c0_27] : memref<1x2x4x128xf32, #tpu.memory_space<vmem>>, vector<1x1x4x128xf32>
    %19 = vector.shape_cast %18 : vector<1x1x4x128xf32> to vector<4x128xf32>
    %20 = vector.extract_strided_slice %19 {offsets = [0, 0], sizes = [4, 1], strides = [1, 1]} : vector<4x128xf32> to vector<4x1xf32>
    %c12_28 = arith.constant 12 : index
    %c127_29 = arith.constant 127 : index
    %21 = vector.load %arg7[%c12_28, %c127_29] : memref<16x128xf32, #tpu.memory_space<vmem>>, vector<4x1xf32>
    tpu.vector_store %arg7[%c12_28, %c127_29], %20 {strides = array<i32>} : memref<16x128xf32, #tpu.memory_space<vmem>>, vector<4x1xf32>,
    %c0_30 = arith.constant 0 : index
    %c0_31 = arith.constant 0 : index
    %22 = vector.load %arg4[%c0_30, %c0_31] : memref<8x16xf32, #tpu.memory_space<vmem>>, vector<8x16xf32>
    %c0_32 = arith.constant 0 : index
    %c0_33 = arith.constant 0 : index
    %23 = vector.load %arg7[%c0_32, %c0_33] : memref<16x128xf32, #tpu.memory_space<vmem>>, vector<16x128xf32>
    %cst = arith.constant dense<0.000000e+00> : vector<8x128xf32>
    %24 = tpu.matmul %22, %23, %cst {dimension_numbers = #tpu.dot_dimension_numbers<[1], [0], [0], [1], [0, 0, 1, 1], [], []>} : vector<8x16xf32>, vector<16x128xf32>, vector<8x128xf32> -> vector<8x128xf32>
    %c0_34 = arith.constant 0 : index
    %c0_35 = arith.constant 0 : index
    %25 = vector.load %arg5[%c0_34, %c0_35] : memref<8x1xf32, #tpu.memory_space<vmem>>, vector<8x1xf32>
    %26 = vector.broadcast %25 : vector<8x1xf32> to vector<8x128xf32>
    %27 = arith.addf %24, %26 : vector<8x128xf32>
    %c0_36 = arith.constant 0 : index
    %c0_37 = arith.constant 0 : index
    %c0_38 = arith.constant 0 : index
    %28 = vector.load %arg6[%c0_36, %c0_37, %c0_38] : memref<1x8x128xf32, #tpu.memory_space<vmem>>, vector<1x8x128xf32>
    %29 = vector.shape_cast %28 : vector<1x8x128xf32> to vector<8x128xf32>
    %30 = vector.shape_cast %27 : vector<8x128xf32> to vector<1x8x128xf32>
    tpu.vector_store %arg6[%c0_36, %c0_37, %c0_38], %30 {strides = array<i32>} : memref<1x8x128xf32, #tpu.memory_space<vmem>>, vector<1x8x128xf32>,
    return
  }
  func.func @transform_0(%arg0: i32, %arg1: i32) -> (i32, i32, i32, i32) {
    %c0_i32 = arith.constant 0 : i32
    %c0_i32_0 = arith.constant 0 : i32
    %c0_i32_1 = arith.constant 0 : i32
    return %arg0, %c0_i32, %c0_i32_0, %arg1 : i32, i32, i32, i32
  }
  func.func @transform_1(%arg0: i32, %arg1: i32) -> (i32, i32, i32, i32) {
    %c1_i32 = arith.constant 1 : i32
    %0 = arith.addi %arg1, %c1_i32 : i32
    %c1_i32_0 = arith.constant 1 : i32
    %1 = arith.muli %0, %c1_i32_0 : i32
    %c0_i32 = arith.constant 0 : i32
    %c0_i32_1 = arith.constant 0 : i32
    %c0_i32_2 = arith.constant 0 : i32
    return %arg0, %c0_i32, %c0_i32_1, %1 : i32, i32, i32, i32
  }
  func.func @transform_2(%arg0: i32, %arg1: i32) -> (i32, i32) {
    %c0_i32 = arith.constant 0 : i32
    %c0_i32_0 = arith.constant 0 : i32
    %c0_i32_1 = arith.constant 0 : i32
    return %c0_i32, %c0_i32_0 : i32, i32
  }
  func.func @transform_3(%arg0: i32, %arg1: i32) -> (i32, i32) {
    %c0_i32 = arith.constant 0 : i32
    %c0_i32_0 = arith.constant 0 : i32
    %c0_i32_1 = arith.constant 0 : i32
    return %c0_i32, %c0_i32_0 : i32, i32
  }
  func.func @transform_4(%arg0: i32, %arg1: i32) -> (i32, i32, i32) {
    %c0_i32 = arith.constant 0 : i32
    %c0_i32_0 = arith.constant 0 : i32
    return %arg0, %c0_i32, %arg1 : i32, i32, i32
  }
}

</mosaic_0001>

<bundles_post_ra>
// kernel: tpu_custom_call.1
= control target key start
LH: loop header
LB: loop body
LE: loop exit
PB: predicated region body
PF: predicated region fallthrough
CT: control target
= control target key end

     0   :  { %s1058_s0 = inlined_call_operand.hbm [shape: f32[2,2,4,256], index: 0, kind: input, shape index: {}]   ;;  %s1059_s1 = inlined_call_operand.hbm [shape: f32[2,2,4,256], index: 1, kind: input, shape index: {}]   ;;  %s1060_s2 = inlined_call_operand.vmem [shape: f32[8,16], index: 2, kind: input, shape index: {}]   ;;  %s1061_s3 = inlined_call_operand.vmem [shape: f32[8,1], index: 3, kind: input, shape index: {}]   ;;  %s1062_s4 = inlined_call_operand.hbm [shape: f32[2,8,8], index: 4, kind: output, shape index: {}]  }
   0x1   :  { %1067 = sst [smem:[#allocation13_spill]] %s1058_s0 }
   0x2   :  { %9 = vsyncpa [#allocation4], 0 }
   0x3   :  { %11 = vsyncpa [#allocation4 + $0x1], 0 }
   0x4   :  { %12 = vsyncpa [#allocation7], 0 }
   0x5   :  { %14 = vsyncpa [#allocation7 + $0x1], 0 }
   0x6   :  { %15 = vsyncpa [#allocation5], 0 }
   0x7   :  { %17 = vsyncpa [#allocation5 + $0x1], 0  ;;  %s816_s15 = smov 0   ;;  %s818_s16 = smov 0  }
   0x8   :  { %s820_s17 = smov 0   ;;  %s822_s18 = smov 0  }
   0x9   :  { %s824_s19 = smov 0   ;;  %s826_s20 = smov 0  }
   0xa LB: > { %s518_s21 = sadd.s32 4294967295, %s778_s20   ;;  %s519_s22 = sadd.s32 4294967294, %s778_s20   ;;  %s778_s20 = sphi %s826_s20, %s23_s20   ;;  %s774_s19 = sphi %s824_s19, %s1086_s19   ;;  %s770_s18 = sphi %s822_s18, %s1085_s18   ;;  %s766_s17 = sphi %s820_s17, %s1084_s17   ;;  %s762_s16 = sphi %s818_s16, %s1083_s16   ;;  %s758_s15 = sphi %s816_s15, %s1082_s15  }
   0xb   : > { %s35_s23 = sadd.s32 1, %s774_s19  ;;  %s44_s24 = sadd.s32 1, %s766_s17 }
   0xc   : > { %p37_p0 = scmp.ge.s32.totalorder %s35_s23, 2  ;;  %p51_p1 = scmp.ne.s32.totalorder %s766_s17, %s762_s16 }
   0xd   : > { %p52_p2 = scmp.eq.s32.totalorder %s778_s20, 0  ;;  %p57_p3 = scmp.ne.s32.totalorder %s762_s16, %s758_s15 }
   0xe   : > { %s1088_s23 = smov (%p37_p0, %s35_s23), 0  ;;  %p58_p5 = scmp.eq.s32.totalorder %s518_s21, 0 }
   0xf   : > { %1068 = sst [smem:[#allocation12_spill]] %s1088_s23  ;;  %p857_p4 = por %p52_p2, %p51_p1 }
  0x10   : > { %s39_s26 = ssub.s32 %s774_s19, %s1088_s23  ;;  %p155_p6 = scmp.eq.s32.totalorder %s518_s21, 1 }
  0x11   : > { %p42_p7 = scmp.eq.s32.totalorder %s39_s26, 0  ;;  %p863_p8 = por %p58_p5, %p57_p3 }
  0x12   : > { %p867_p9 = por %p155_p6, %p51_p1  ;;  %p161_p10 = scmp.eq.s32.totalorder %s519_s22, 1 }
  0x13   : > { %s1070_s27 = scalar_select %p863_p8, 1, 0 }
  0x14   : > { %s1071_s28 = scalar_select %p867_p9, 1, 0 }
  0x15   : > { %s872_s29 = scalar_select %p42_p7, %s766_s17, %s44_s24  }
  0x16   : > { %p874_p11 = por %p161_p10, %p57_p3  ;;  %p572_p13 = scmp.lt.s32.totalorder %s778_s20, 2 }
  0x17   : > { %s881_s5 = sand.u32 1, %s766_s17   ;;  %s540_s7 = sshll.u32 %s774_s19, 8 }
  0x18   : > { %s1072_s30 = scalar_select %p874_p11, 1, 0 }
  0x19   : > { %s522_s6 = sshll.u32 %s881_s5, 3  ;;  %s1073_s0 = sld [smem:[#allocation13_spill]] }
  0x1a   : > { %s191_s11 = scalar_lea.vmem [#allocation3], %s522_s6  ;;  %p898_p0 = pnand %p572_p13, %p857_p4 }
  0x1b   : > { %s199_s12 = sshll.u32 %s191_s11, 4  ;;  %s188_s14 = scalar_lea.sflag [#allocation4], %s881_s5  ;;  %s894_s12 = int_to_ptr.vmem [resolvable:$true] %s199_s12 }
  0x1c   : > { %p633_p2 = pneg %p898_p0 }
  0x1f   : > { %s890_s10 = scalar_lea.hbm %s1073_s0, %s540_s7  ;;  %s636_s26 = scalar_lea.hbm %s1073_s0, 512 }
  0x20   : > { %s631_s21 = scalar_lea.hbm %s890_s10, 128  ;;  %p637_p4 = scmp.lt.u32.totalorder %s890_s10, %s1073_s0 }
  0x21   : > { %p632_p1 = scmp.ne.s32.totalorder %s890_s10, %s631_s21  ;;  %p638_p6 = scmp.lt.u32.totalorder %s636_s26, %s631_s21 }
  0x22   : > { %p640_p10 = scmp.lt.u32.totalorder %s631_s21, %s890_s10 }
  0x23   : > { %p634_p3 = pnand %p633_p2, %p632_p1  ;;  %p639_p7 = por %p638_p6, %p637_p4 }
  0x25   : > { %p635_p5 = pneg %p634_p3  ;;  %p641_p13 = por %p640_p10, %p639_p7 }
  0x27   : > { %p642_p12 = pnand %p641_p13, %p635_p5 }
  0x29   : > { %645 = shalt.err (!%p642_p12)
}
  0x2a   : > { %s646_s9 = scalar_lea.vmem %s894_s12, 128  ;;  %s780_s11 = smov [#allocation3]  }
  0x2b   : > { %p647_p1 = scmp.ne.s32.totalorder %s894_s12, %s646_s9  ;;  %s651_s22 = sshll.u32 %s780_s11, 4  ;;  %s652_s22 = int_to_ptr.vmem [resolvable:$false] %s651_s22 }
  0x2c   : > { %s653_s24 = scalar_lea.vmem %s652_s22, 256  ;;  %p654_p9 = scmp.lt.s32.totalorder %s894_s12, %s652_s22 }
  0x2d   : > { %p649_p3 = pnand %p647_p1, %p633_p2  ;;  %p655_p4 = scmp.lt.s32.totalorder %s653_s24, %s646_s9 }
  0x2f   : > { %p650_p11 = pneg %p649_p3  ;;  %p656_p6 = por %p655_p4, %p654_p9 }
  0x31   : > { %p657_p7 = pnand %p656_p6, %p650_p11 }
  0x33   : > { %660 = shalt.err (!%p657_p7)
}
  0x34   : > { %s1065_s21 = smov 128   ;;  %s782_s26 = smov 64  }
  0x35   : > { %s783_s25 = smov 4   ;;  %p528_p9 = scmp.ge.s32.totalorder %s778_s20, 1 }
  0x36   : > { %564 = dma.hbm_to_vmem [thread:$0]  (!%p898_p0), %s890_s10, 128, %s894_s12, %s188_s14, %s1065_s21, %s782_s26, %s783_s25  }
  0x37   : > { %p230_p11 = scmp.lt.s32.totalorder %s778_s20, 3  ;;  %s451_s22 = scalar_lea.hbm %s1059_s1, %s540_s7 }
  0x38   : > { %s944_s24 = scalar_lea.hbm %s451_s22, 64  ;;  %s213_s0 = scalar_lea.vmem [#allocation6], %s522_s6 }
  0x39   : > { %p935_p12 = pnand %p528_p9, %p230_p11  ;;  %s222_s23 = sshll.u32 %s213_s0, 4  ;;  %s948_s23 = int_to_ptr.vmem [resolvable:$true] %s222_s23 }
  0x3a   : > { %s210_s10 = scalar_lea.sflag [#allocation7], %s881_s5  ;;  %s691_s12 = scalar_lea.hbm %s451_s22, 192 }
  0x3b   : > { %p662_p5 = scmp.ne.s32.totalorder %s944_s24, %s691_s12  ;;  %s666_s7 = scalar_lea.hbm %s1059_s1, 512 }
  0x3c   : > { %p667_p1 = scmp.lt.u32.totalorder %s944_s24, %s1059_s1  ;;  %p668_p3 = scmp.lt.u32.totalorder %s666_s7, %s691_s12 }
  0x3d   : > { %p664_p10 = pnand %p662_p5, %p633_p2  ;;  %p670_p6 = scmp.lt.u32.totalorder %s691_s12, %s944_s24 }
  0x3e   : > { %p669_p4 = por %p668_p3, %p667_p1 }
  0x3f   : > { %p665_p13 = pneg %p664_p10 }
  0x40   : > { %p671_p7 = por %p670_p6, %p669_p4 }
  0x42   : > { %p672_p9 = pnand %p671_p7, %p665_p13 }
  0x44   : > { %675 = shalt.err (!%p672_p9)
}
  0x45   : > { %s676_s0 = scalar_lea.vmem %s948_s23, 128  ;;  %s784_s6 = smov [#allocation6]  }
  0x46   : > { %p677_p11 = scmp.ne.s32.totalorder %s948_s23, %s676_s0  ;;  %s681_s22 = sshll.u32 %s784_s6, 4  ;;  %s682_s22 = int_to_ptr.vmem [resolvable:$false] %s681_s22 }
  0x47   : > { %s683_s21 = scalar_lea.vmem %s682_s22, 256  ;;  %p684_p8 = scmp.lt.s32.totalorder %s948_s23, %s682_s22 }
  0x48   : > { %p679_p5 = pnand %p677_p11, %p633_p2  ;;  %p685_p1 = scmp.lt.s32.totalorder %s683_s21, %s676_s0 }
  0x4a   : > { %p680_p10 = pneg %p679_p5  ;;  %p686_p3 = por %p685_p1, %p684_p8 }
  0x4c   : > { %p687_p4 = pnand %p686_p3, %p680_p10 }
  0x4e   : > { %690 = shalt.err (!%p687_p4)
}
  0x4f   : > { %s1076_s12 = smov 128   ;;  %234 = sbr.rel (%p935_p12) target bundleno = 452 (0x1c4), region = 36 }
  0x50   : > { %567 = dma.hbm_to_vmem [thread:$0]  (!%p898_p0), %s944_s24, 128, %s948_s23, %s210_s10, %s1076_s12, %s782_s26, %s783_s25  }
  0x51   : > { %s981_s14 = sand.u32 (!%p935_p12), 1, %s762_s16   ;;  %p1077_p8 = scmp.ne.s32.totalorder (!%p935_p12), %s1070_s27, 0 }
  0x52   : > { %s984_s9 = sshll.u32 (!%p935_p12), %s981_s14, 3  ;;  %s237_s13 = scalar_lea.sflag (!%p935_p12), [#allocation4], %s981_s14 }
  0x53   : > { %s240_s7 = scalar_lea.vmem (!%p935_p12), [#allocation3], %s984_s9 }
  0x56   : > { %745 = dma.done.wait (%p1077_p8), %s237_s13, 128  }
  0x57   : > { %747 = vsyncadd (%p1077_p8), %s237_s13, 4294967168  ;;  %s246_s23 = scalar_lea.sflag [#allocation7], %s981_s14  ;;  %s249_s5 = scalar_lea.vmem [#allocation6], %s984_s9 }
  0x58   : > { %749 = dma.done.wait (%p1077_p8), %s246_s23, 128  }
  0x59   : > { %751 = vsyncadd (%p1077_p8), %s246_s23, 4294967168  ;;  %v785_v0 = vmov 0.0|0.0   ;;  %v285_v1 = vld [vmem:[%s240_s7] sm:$0xf]  ;;  %v292_v2 = vld [vmem:[%s249_s5] sm:$0xf] }
  0x5a   : > { %552 = vmatprep.subr.bf16.mxu0 %v785_v0  ;;  %s786_s26 = smov 127   ;;  %v280_v3 = vld [vmem:[%s240_s7] sm:$0xff]   ;;  %v534_v5 = vld [vmem:[%s249_s5 + $0x4] sm:$0xf]  ;;  %vm787_vm0 = vmmov 0   ;;  %v788_v6 = vmov 0.0  }
  0x5b   : > { %287 = vrot.lane.b32.xlu0 %v285_v1, %s786_s26  ;;  %294 = vrot.lane.b32.xlu1 %v292_v2, %s786_s26  ;;  %v533_v4 = vld [vmem:[%s240_s7 + $0x4] sm:$0xf]  ;;  %281 = vst [vmem:[#allocation2] sm:$0xff] %v280_v3   ;;  %v315_v7 = vld [vmem:[%s1061_s3] sm:$0xff]  ;;  %v789_v8 = vmov 0   ;;  %vm290_vm1 = vcmask 1035264  }
  0x5c   : > { %549 = vmatprep.mubr.msk.f32.mxu0 %vm787_vm0, %v788_v6  ;;  %630 = vset.pattern.permute.xlu0 %v789_v8  ;;  %vm297_vm2 = vcmask 1044472   ;;  %v312_v16 = vld [vmem:[%s1060_s2] sm:$0xff]  ;;  %vm321_vm3 = vcmask 130048   ;;  %s537_s10 = sshll.u32 %s770_s18, 7  ;;  %s278_s11 = scalar_lea.vmem [#allocation8], %s984_s9 }
  0x5d   : > { %s411_s0 = sshll.u32 %s278_s11, 4  ;;  %s1009_s21 = scalar_lea.hbm %s1062_s4, %s537_s10  ;;  %s1011_s0 = int_to_ptr.vmem [resolvable:$true] %s411_s0 }
  0x5e   : > { %s397_s12 = scalar_lea.sflag [#allocation5], %s981_s14  ;;  %s692_s13 = scalar_lea.vmem %s1011_s0, 128 }
  0x5f   : > { %301 = vrot.lane.b32.xlu0 %v533_v4, %s786_s26  ;;  %308 = vrot.lane.b32.xlu1 %v534_v5, %s786_s26  ;;  %p693_p0 = scmp.ne.s32.totalorder %s1011_s0, %s692_s13  ;;  %p1078_p2 = scmp.ne.s32.totalorder %s1071_s28, 0 }
  0x60   : > { %s790_s18 = smov [#allocation8]  }
  0x61   : > { %p694_p12 = pnand %p693_p0, %p1078_p2  ;;  %s696_s9 = sshll.u32 %s790_s18, 4  ;;  %s697_s9 = int_to_ptr.vmem [resolvable:$false] %s696_s9 }
  0x62   : > { %v313_v13 = vld [vmem:[#allocation2] sm:$0xff]  ;;  %s698_s7 = scalar_lea.vmem %s697_s9, 256  ;;  %p699_p6 = scmp.lt.s32.totalorder %s1011_s0, %s697_s9 }
  0x63   : > { %318 = vperm.xlu0 %630, %v315_v7   ;;  %p695_p13 = pneg %p694_p12  ;;  %p700_p7 = scmp.lt.s32.totalorder %s698_s7, %s692_s13 }
  0x65   : > { %p701_p9 = por %p700_p7, %p699_p6 }
  0x67   : > { %p702_p11 = pnand %p701_p9, %p695_p13 }
  0xcd   : > { %v288_v9 = vpop.permute.xlu0 %287  ;;  %v295_v10 = vpop.permute.xlu1 %294 }
  0xce   : > { %291 = vst.msk [vmem:[#allocation2 + $0x8] sm:$0xf] %vm290_vm1, %v288_v9 }
  0xcf   : > { %298 = vst.msk [vmem:[#allocation2 + $0x8] sm:$0xf] %vm297_vm2, %v295_v10 }
  0xd1   : > { %v302_v11 = vpop.permute.xlu0 %301  ;;  %v309_v12 = vpop.permute.xlu1 %308 }
  0xd2   : > { %304 = vst.msk [vmem:[#allocation2 + $0xc] sm:$0xf] %vm290_vm1, %v302_v11 }
  0xd3   : > { %311 = vst.msk [vmem:[#allocation2 + $0xc] sm:$0xf] %vm297_vm2, %v309_v12 }
  0xda   : > { %v314_v14 = vld [vmem:[#allocation2 + $0x8] sm:$0xff] }
  0xdb   : > { %v553_v15 = vpack.c.bf16 %v314_v14, %v313_v13 }
  0xdd   : > { %554 = vmatpush3.bf16.msra.mxu0 %v553_v15 }
  0xe0   : > { %550 = vmatmul.mubr.msk.f32.vlgmr.msra.gmra.mrb[0].mxu0 %vm321_vm3, %v312_v16 }
  0xe2   : > { %v319_v17 = vpop.permute.xlu0 %318 }
 0x1b3   : > { %v391_v18 = vpop.f32.mrb[0].mxu0 }
 0x1b4   : > { %v392_v19 = vadd.f32 %v391_v18, %v319_v17  ;;  %v551_v20 = vpop.f32.mrb[1].mxu0 }
 0x1b6   : > { %395 = vst [vmem:[%s278_s11] sm:$0xff] %v392_v19 }
 0x1b7   : > { %705 = shalt.err (!%p702_p11)
}
 0x1b8   : > { %s706_s14 = scalar_lea.hbm %s1009_s21, 128  ;;  %s710_s26 = scalar_lea.hbm %s1062_s4, 256 }
 0x1b9   : > { %p707_p5 = scmp.ne.s32.totalorder %s1009_s21, %s706_s14  ;;  %p711_p3 = scmp.lt.u32.totalorder %s1009_s21, %s1062_s4 }
 0x1ba   : > { %p712_p4 = scmp.lt.u32.totalorder %s710_s26, %s706_s14  ;;  %p714_p0 = scmp.lt.u32.totalorder %s706_s14, %s1009_s21 }
 0x1bb   : > { %p708_p10 = pnand %p707_p5, %p1078_p2 }
 0x1bc   : > { %p713_p8 = por %p712_p4, %p711_p3 }
 0x1bd   : > { %p709_p1 = pneg %p708_p10 }
 0x1be   : > { %p715_p12 = por %p714_p0, %p713_p8 }
 0x1c0   : > { %p716_p13 = pnand %p715_p12, %p709_p1 }
 0x1c2   : > { %719 = shalt.err (!%p716_p13)
}
 0x1c3   : > { %559 = dma.vmem_to_hbm [thread:$0]  (%p1078_p2), %s1011_s0, 128, %s1009_s21, %s397_s12  }
 0x1c4 PF: > { %s423_s27 = sand.u32 1, %s758_s15   ;;  %p1079_p6 = scmp.ne.s32.totalorder %s1072_s30, 0 }
 0x1c5   : > { %p1080_p7 = scmp.ge.s32.totalorder %s778_s20, 2  ;;  %s424_s24 = scalar_lea.sflag [#allocation5], %s423_s27 }
 0x1c7   : > { %p569_p9 = pnand %p1080_p7, %p1079_p6 }
 0x1c9   : > { %753 = dma.done.wait (!%p569_p9), %s424_s24, 128  }
 0x1ca   : > { %755 = vsyncadd (!%p569_p9), %s424_s24, 4294967168  ;;  %s23_s20 = sadd.s32 1, %s778_s20   ;;  %s1081_s28 = sld [smem:[#allocation12_spill]] }
 0x1cb   : > { %p20_p11 = scmp.ge.s32.totalorder %s23_s20, 4   ;;  %s1082_s15 = smov %s762_s16 }
 0x1cc   : > { %s1083_s16 = smov %s766_s17  ;;  %s1084_s17 = smov %s872_s29 }
 0x1cd   : > { %s1085_s18 = smov %s774_s19  ;;  %22 = sbr.rel (!%p20_p11) target bundleno = 10 (0xa), region = 96 }
 0x1d0   : > { %s1086_s19 = smov %s1081_s28 }
 0x1d4   :  { %429 = vsyncpa [#allocation4], 1 }
 0x1d5   :  { %431 = vsyncpa [#allocation4 + $0x1], 1 }
 0x1d6   :  { %432 = vsyncpa [#allocation7], 1 }
 0x1d7   :  { %434 = vsyncpa [#allocation7 + $0x1], 1 }
 0x1d8   :  { %435 = vsyncpa [#allocation5], 1 }
 0x1d9   :  { %437 = vsyncpa [#allocation5 + $0x1], 1 }

</bundles_post_ra>
